<compile_context>
chip_gen: v5e
topology: v5e:2x2
jax: 0.10.0
libtpu: 0.0.40
codegen_flags: <defaults>
</compile_context>

<pallas_src>
import jax
import jax.numpy as jnp
from jax.experimental import pallas as pl
from jax.experimental.pallas import tpu as pltpu

# ----------------------------- hyper-parameters ------------------------------
NUM_CODES = 8
NUM_LATENT = 4
RECURRENT_SIZE = 16
LATENT_DIM = 32
ACTION_SIZE = 8
HIDDEN_DIM = 32
UNIMIX = 0.01
BATCH = 2                               # demo batch; wrapper pads / tiles

Z_DIM = NUM_CODES * NUM_LATENT          # 32  (zt feature width)
R_DIM = RECURRENT_SIZE                  # 16  (ht feature width)
CAT_DIM = Z_DIM + R_DIM                 # 48  (projection input dim)

NEG_INF = -1.0e30                       # logits padding value (exp -> 0)

# ------------------------- packed-parameter slab layout -----------------------
# One contiguous f32 [SLAB_ROWS, HIDDEN_DIM] array; every segment starts on an
# 8-row (sublane-tile) boundary.  All four biases share ONE 8-row segment
# (one bias per sublane row).
SLAB_COLS = HIDDEN_DIM                  # 32 (widest feature dim; wo/bo padded)
ROW_W1Z = 0                             # (Z_DIM, H)  folded (Wp @ W1), zt rows
ROW_W1H = ROW_W1Z + Z_DIM               # (R_DIM, H)  folded (Wp @ W1), ht rows
ROW_B   = ROW_W1H + R_DIM               # 8-row bias block:
#   row +0: bp @ W1 + b1   row +1: b2   row +2: b3
#   row +3: bo (cols [A:] = NEG_INF so full-width softmax is exact)
ROW_W2  = ROW_B + 8                     # (H, H)
ROW_W3  = ROW_W2 + HIDDEN_DIM           # (H, H)
ROW_WO  = ROW_W3 + HIDDEN_DIM           # (H, A) in cols [0:A], rest zero
SLAB_ROWS = ROW_WO + HIDDEN_DIM         # 152


def _default_batch_tile():
    """MXU-height batch tile: 128 on v5e (4x128x128 MXU), 256 on v6e/v7x."""
    try:
        kind = jax.devices()[0].device_kind.lower()
        if "v5" in kind:
            return 128
    except Exception:
        pass
    return 256


BATCH_TILE = _default_batch_tile()


# --------------------------------- kernel ------------------------------------
def actor_kernel(zt_ref, ht_ref, slab_ref, out_ref):
    """fused(concat + projection + layer1) -> 2x(Linear+ReLU) -> Linear
       -> full-width softmax -> unimix mixture."""
    zt = zt_ref[...]                                      # (BT, Z_DIM)
    ht = ht_ref[...]                                      # (BT, R_DIM)

    # static, tile-aligned views into the packed parameter slab
    w1_z = slab_ref[ROW_W1Z:ROW_W1Z + Z_DIM, :]           # (Z_DIM, H)
    w1_h = slab_ref[ROW_W1H:ROW_W1H + R_DIM, :]           # (R_DIM, H)
    w2   = slab_ref[ROW_W2:ROW_W2 + HIDDEN_DIM, :]        # (H, H)
    w3   = slab_ref[ROW_W3:ROW_W3 + HIDDEN_DIM, :]        # (H, H)
    wo   = slab_ref[ROW_WO:ROW_WO + HIDDEN_DIM, :]        # (H, SLAB_COLS)

    # biases: one tile-aligned load of the 8-row block, then static row slices
    bias_blk = slab_ref[ROW_B:ROW_B + 8, :]               # (8, SLAB_COLS)
    b1 = bias_blk[0:1, :]
    b2 = bias_blk[1:2, :]
    b3 = bias_blk[2:3, :]
    bo = bias_blk[3:4, :]                                 # padded cols = -1e30

    # concat + projection + first hidden layer, fused and folded:
    #   h = ReLU( [zt, ht] @ (Wp @ W1) + (bp @ W1 + b1) )
    h = (jnp.dot(zt, w1_z, preferred_element_type=jnp.float32)
         + jnp.dot(ht, w1_h, preferred_element_type=jnp.float32)
         + b1)
    h = jnp.maximum(h, 0.0)

    h = jnp.maximum(
        jnp.dot(h, w2, preferred_element_type=jnp.float32) + b2, 0.0)
    h = jnp.maximum(
        jnp.dot(h, w3, preferred_element_type=jnp.float32) + b3, 0.0)

    # output head -> full-width logits.  wo columns beyond ACTION_SIZE are 0,
    # bo columns beyond ACTION_SIZE are -1e30, so softmax over all 32 lanes is
    # exact for the real actions (padded exp -> 0) and no sub-lane slice or
    # 8-lane masked store is needed in-kernel.
    logits = jnp.dot(h, wo, preferred_element_type=jnp.float32) + bo

    m = jnp.max(logits, axis=-1, keepdims=True)
    e = jnp.exp(logits - m)
    denom = jnp.sum(e, axis=-1, keepdims=True)
    learned_probs = e * pl.reciprocal(denom, approx=True)     # EUP vrcp

    # unimix mixture — reference uses 1/num_codes (NOT 1/action_size);
    # kept as-is to match the PyTorch module (here NUM_CODES == ACTION_SIZE).
    uniform = 1.0 / NUM_CODES
    out_ref[...] = (1.0 - UNIMIX) * learned_probs + UNIMIX * uniform


# -------------------------------- wrapper -------------------------------------
def _round_up(x, m):
    return ((x + m - 1) // m) * m


@jax.jit
def actor_forward(zt, ht, slab):
    b = zt.shape[0]
    bp = _round_up(max(b, 1), 8)            # fill the f32 sublane tile
    bt = min(BATCH_TILE, bp)                # MXU-height batch tile
    bp = _round_up(bp, bt)                  # grid-divisible padded batch

    zt32 = jnp.asarray(zt, jnp.float32)
    ht32 = jnp.asarray(ht, jnp.float32)
    if bp != b:
        zt32 = jnp.pad(zt32, ((0, bp - b), (0, 0)))
        ht32 = jnp.pad(ht32, ((0, bp - b), (0, 0)))

    out = pl.pallas_call(
        actor_kernel,
        out_shape=jax.ShapeDtypeStruct((bp, SLAB_COLS), jnp.float32),
        grid_spec=pltpu.PrefetchScalarGridSpec(
            num_scalar_prefetch=0,
            grid=(bp // bt,),
            in_specs=[
                pl.BlockSpec((bt, Z_DIM), lambda i: (i, 0)),
                pl.BlockSpec((bt, R_DIM), lambda i: (i, 0)),
                # constant block index -> slab DMA'd into VMEM once per call
                pl.BlockSpec((SLAB_ROWS, SLAB_COLS), lambda i: (0, 0)),
            ],
            out_specs=pl.BlockSpec((bt, SLAB_COLS), lambda i: (i, 0)),
        ),
        compiler_params=pltpu.CompilerParams(
            dimension_semantics=("parallel",)),
    )(zt32, ht32, slab)

    # drop batch padding and the 24 padded action lanes
    return out[:b, :ACTION_SIZE]


# --------------------------- parameter construction ---------------------------
def init_params(key):
    """PyTorch-like init (uniform ±1/sqrt(fan_in)); biases kept as (1, dim)."""
    def linear(key, fan_in, fan_out):
        k_w, k_b = jax.random.split(key)
        bound = 1.0 / (fan_in ** 0.5)
        w = jax.random.uniform(k_w, (fan_in, fan_out), jnp.float32, -bound, bound)
        b = jax.random.uniform(k_b, (1, fan_out), jnp.float32, -bound, bound)
        return w, b

    keys = jax.random.split(key, 5)
    wp, bp = linear(keys[0], CAT_DIM, LATENT_DIM)
    w1, b1 = linear(keys[1], LATENT_DIM, HIDDEN_DIM)
    w2, b2 = linear(keys[2], HIDDEN_DIM, HIDDEN_DIM)
    w3, b3 = linear(keys[3], HIDDEN_DIM, HIDDEN_DIM)
    wo, bo = linear(keys[4], HIDDEN_DIM, ACTION_SIZE)
    return dict(wp=wp, bp=bp, w1=w1, b1=b1, w2=w2, b2=b2,
                w3=w3, b3=b3, wo=wo, bo=bo)


def pack_params(params):
    """Fold projection into MLP layer 1 and pack all params into one slab.
    Runs once, outside the per-step hot path."""
    w1f = params["wp"] @ params["w1"]                     # (CAT_DIM, H)
    b1f = params["bp"] @ params["w1"] + params["b1"]      # (1, H)

    slab = jnp.zeros((SLAB_ROWS, SLAB_COLS), jnp.float32)

    def put(s, row, arr):
        r, c = arr.shape
        return s.at[row:row + r, :c].set(arr)

    slab = put(slab, ROW_W1Z, w1f[:Z_DIM])                # zt rows of folded W1
    slab = put(slab, ROW_W1H, w1f[Z_DIM:])                # ht rows of folded W1

    # packed bias block: one bias per sublane row
    slab = put(slab, ROW_B + 0, b1f)
    slab = put(slab, ROW_B + 1, params["b2"])
    slab = put(slab, ROW_B + 2, params["b3"])
    bo_padded = jnp.full((1, SLAB_COLS), NEG_INF, jnp.float32)
    bo_padded = bo_padded.at[:, :ACTION_SIZE].set(params["bo"])
    slab = put(slab, ROW_B + 3, bo_padded)                # full width on purpose

    slab = put(slab, ROW_W2, params["w2"])
    slab = put(slab, ROW_W3, params["w3"])
    slab = put(slab, ROW_WO, params["wo"])                # (H, A) -> cols [0:A]
    return slab


# ------------------------------ pure-JAX reference -----------------------------
def actor_reference(zt, ht, params):
    st = jnp.concatenate([zt, ht], axis=-1)
    x = st @ params["wp"] + params["bp"]
    h = jnp.maximum(x @ params["w1"] + params["b1"], 0.0)
    h = jnp.maximum(h @ params["w2"] + params["b2"], 0.0)
    h = jnp.maximum(h @ params["w3"] + params["b3"], 0.0)
    logits = h @ params["wo"] + params["bo"]
    probs = jax.nn.softmax(logits, axis=-1)
    return (1.0 - UNIMIX) * probs + UNIMIX * (1.0 / NUM_CODES)


# ----------------------------------- main -------------------------------------
if __name__ == "__main__":
    key = jax.random.PRNGKey(0)
    k_z, k_h, k_p, k_z2, k_h2 = jax.random.split(key, 5)

    params = init_params(k_p)
    slab = pack_params(params)

    # --- small demo batch (padded to one 8-row tile, grid = 1) ---------------
    zt = jax.random.normal(k_z, (BATCH, Z_DIM), jnp.float32)
    ht = jax.random.normal(k_h, (BATCH, R_DIM), jnp.float32)

    mixture_probs = actor_forward(zt, ht, slab)
    jax.block_until_ready(mixture_probs)

    assert mixture_probs.shape == (BATCH, ACTION_SIZE)
    assert mixture_probs.dtype == jnp.float32

    ref = actor_reference(zt, ht, params)
    # tolerance accounts for pl.reciprocal(approx=True) in the softmax denom
    assert jnp.allclose(mixture_probs, ref, atol=2e-3), \
        f"max abs err {jnp.max(jnp.abs(mixture_probs - ref))}"

    # --- larger batch: exercises padding + multi-tile "parallel" grid --------
    big_b = 2 * BATCH_TILE + 3
    zt_big = jax.random.normal(k_z2, (big_b, Z_DIM), jnp.float32)
    ht_big = jax.random.normal(k_h2, (big_b, R_DIM), jnp.float32)
    out_big = actor_forward(zt_big, ht_big, slab)
    jax.block_until_ready(out_big)
    ref_big = actor_reference(zt_big, ht_big, params)
    assert out_big.shape == (big_b, ACTION_SIZE)
    assert jnp.allclose(out_big, ref_big, atol=2e-3), \
        f"max abs err {jnp.max(jnp.abs(out_big - ref_big))}"

    print("KERNEL_OK")
</pallas_src>

<mosaic_0001>
module attributes {stable_mosaic.version = 11 : i64} {
  func.func @actor_kernel(%arg0: i32, %arg1: memref<8x32xf32, #tpu.memory_space<vmem>>, %arg2: memref<8x16xf32, #tpu.memory_space<vmem>>, %arg3: memref<152x32xf32, #tpu.memory_space<vmem>>, %arg4: memref<8x32xf32, #tpu.memory_space<vmem>>) attributes {dimension_semantics = [#tpu.dimension_semantics<parallel>], iteration_bounds = array<i64: 1>, scalar_prefetch = 0 : i64, scratch_operands = 0 : i64, tpu.core_type = #tpu.core_type<tc>, window_params = [{transform_indices = @transform_0, window_bounds = array<i64: 8, 32>}, {transform_indices = @transform_1, window_bounds = array<i64: 8, 16>}, {pipeline_mode = #tpu.pipeline_mode<synchronous>, transform_indices = @transform_2, window_bounds = array<i64: 152, 32>}, {transform_indices = @transform_3, window_bounds = array<i64: 8, 32>}]} {
    %c0 = arith.constant 0 : index
    %c0_0 = arith.constant 0 : index
    %0 = vector.load %arg1[%c0, %c0_0] : memref<8x32xf32, #tpu.memory_space<vmem>>, vector<8x32xf32>
    %c0_1 = arith.constant 0 : index
    %c0_2 = arith.constant 0 : index
    %1 = vector.load %arg2[%c0_1, %c0_2] : memref<8x16xf32, #tpu.memory_space<vmem>>, vector<8x16xf32>
    %c0_3 = arith.constant 0 : index
    %c0_4 = arith.constant 0 : index
    %2 = vector.load %arg3[%c0_3, %c0_4] : memref<152x32xf32, #tpu.memory_space<vmem>>, vector<32x32xf32>
    %c32 = arith.constant 32 : index
    %c0_5 = arith.constant 0 : index
    %3 = vector.load %arg3[%c32, %c0_5] : memref<152x32xf32, #tpu.memory_space<vmem>>, vector<16x32xf32>
    %c56 = arith.constant 56 : index
    %c0_6 = arith.constant 0 : index
    %4 = vector.load %arg3[%c56, %c0_6] : memref<152x32xf32, #tpu.memory_space<vmem>>, vector<32x32xf32>
    %c88 = arith.constant 88 : index
    %c0_7 = arith.constant 0 : index
    %5 = vector.load %arg3[%c88, %c0_7] : memref<152x32xf32, #tpu.memory_space<vmem>>, vector<32x32xf32>
    %c120 = arith.constant 120 : index
    %c0_8 = arith.constant 0 : index
    %6 = vector.load %arg3[%c120, %c0_8] : memref<152x32xf32, #tpu.memory_space<vmem>>, vector<32x32xf32>
    %c48 = arith.constant 48 : index
    %c0_9 = arith.constant 0 : index
    %7 = vector.load %arg3[%c48, %c0_9] : memref<152x32xf32, #tpu.memory_space<vmem>>, vector<8x32xf32>
    %8 = vector.extract_strided_slice %7 {offsets = [0, 0], sizes = [1, 32], strides = [1, 1]} : vector<8x32xf32> to vector<1x32xf32>
    %9 = vector.extract_strided_slice %7 {offsets = [1, 0], sizes = [1, 32], strides = [1, 1]} : vector<8x32xf32> to vector<1x32xf32>
    %10 = vector.extract_strided_slice %7 {offsets = [2, 0], sizes = [1, 32], strides = [1, 1]} : vector<8x32xf32> to vector<1x32xf32>
    %11 = vector.extract_strided_slice %7 {offsets = [3, 0], sizes = [1, 32], strides = [1, 1]} : vector<8x32xf32> to vector<1x32xf32>
    %cst = arith.constant dense<0.000000e+00> : vector<8x32xf32>
    %12 = tpu.matmul %0, %2, %cst {dimension_numbers = #tpu.dot_dimension_numbers<[1], [0], [0], [1], [0, 0, 1, 1], [], []>} : vector<8x32xf32>, vector<32x32xf32>, vector<8x32xf32> -> vector<8x32xf32>
    %cst_10 = arith.constant dense<0.000000e+00> : vector<8x32xf32>
    %13 = tpu.matmul %1, %3, %cst_10 {dimension_numbers = #tpu.dot_dimension_numbers<[1], [0], [0], [1], [0, 0, 1, 1], [], []>} : vector<8x16xf32>, vector<16x32xf32>, vector<8x32xf32> -> vector<8x32xf32>
    %14 = arith.addf %12, %13 : vector<8x32xf32>
    %15 = vector.broadcast %8 : vector<1x32xf32> to vector<8x32xf32>
    %16 = arith.addf %14, %15 : vector<8x32xf32>
    %cst_11 = arith.constant 0.000000e+00 : f32
    %17 = vector.broadcast %cst_11 : f32 to vector<8x32xf32>
    %18 = arith.maximumf %16, %17 : vector<8x32xf32>
    %cst_12 = arith.constant dense<0.000000e+00> : vector<8x32xf32>
    %19 = tpu.matmul %18, %4, %cst_12 {dimension_numbers = #tpu.dot_dimension_numbers<[1], [0], [0], [1], [0, 0, 1, 1], [], []>} : vector<8x32xf32>, vector<32x32xf32>, vector<8x32xf32> -> vector<8x32xf32>
    %20 = vector.broadcast %9 : vector<1x32xf32> to vector<8x32xf32>
    %21 = arith.addf %19, %20 : vector<8x32xf32>
    %cst_13 = arith.constant 0.000000e+00 : f32
    %22 = vector.broadcast %cst_13 : f32 to vector<8x32xf32>
    %23 = arith.maximumf %21, %22 : vector<8x32xf32>
    %cst_14 = arith.constant dense<0.000000e+00> : vector<8x32xf32>
    %24 = tpu.matmul %23, %5, %cst_14 {dimension_numbers = #tpu.dot_dimension_numbers<[1], [0], [0], [1], [0, 0, 1, 1], [], []>} : vector<8x32xf32>, vector<32x32xf32>, vector<8x32xf32> -> vector<8x32xf32>
    %25 = vector.broadcast %10 : vector<1x32xf32> to vector<8x32xf32>
    %26 = arith.addf %24, %25 : vector<8x32xf32>
    %cst_15 = arith.constant 0.000000e+00 : f32
    %27 = vector.broadcast %cst_15 : f32 to vector<8x32xf32>
    %28 = arith.maximumf %26, %27 : vector<8x32xf32>
    %cst_16 = arith.constant dense<0.000000e+00> : vector<8x32xf32>
    %29 = tpu.matmul %28, %6, %cst_16 {dimension_numbers = #tpu.dot_dimension_numbers<[1], [0], [0], [1], [0, 0, 1, 1], [], []>} : vector<8x32xf32>, vector<32x32xf32>, vector<8x32xf32> -> vector<8x32xf32>
    %30 = vector.broadcast %11 : vector<1x32xf32> to vector<8x32xf32>
    %31 = arith.addf %29, %30 : vector<8x32xf32>
    %cst_17 = arith.constant dense<0xFF800000> : vector<8xf32>
    %32 = vector.multi_reduction <maximumf>, %31, %cst_17 [1] : vector<8x32xf32> to vector<8xf32>
    %33 = vector.shape_cast %32 : vector<8xf32> to vector<8x1xf32>
    %34 = vector.broadcast %33 : vector<8x1xf32> to vector<8x32xf32>
    %35 = arith.subf %31, %34 : vector<8x32xf32>
    %36 = math.exp %35 : vector<8x32xf32>
    %cst_18 = arith.constant dense<0.000000e+00> : vector<8xf32>
    %37 = vector.multi_reduction <add>, %36, %cst_18 [1] : vector<8x32xf32> to vector<8xf32>
    %38 = vector.shape_cast %37 : vector<8xf32> to vector<8x1xf32>
    %39 = tpu.reciprocal %38 {approx = true} : vector<8x1xf32> -> vector<8x1xf32>
    %40 = vector.broadcast %39 : vector<8x1xf32> to vector<8x32xf32>
    %41 = arith.mulf %36, %40 : vector<8x32xf32>
    %cst_19 = arith.constant 9.900000e-01 : f32
    %42 = vector.broadcast %cst_19 : f32 to vector<8x32xf32>
    %43 = arith.mulf %42, %41 : vector<8x32xf32>
    %cst_20 = arith.constant 1.250000e-03 : f32
    %44 = vector.broadcast %cst_20 : f32 to vector<8x32xf32>
    %45 = arith.addf %43, %44 : vector<8x32xf32>
    %c0_21 = arith.constant 0 : index
    %c0_22 = arith.constant 0 : index
    %46 = vector.load %arg4[%c0_21, %c0_22] : memref<8x32xf32, #tpu.memory_space<vmem>>, vector<8x32xf32>
    tpu.vector_store %arg4[%c0_21, %c0_22], %45 {strides = array<i32>} : memref<8x32xf32, #tpu.memory_space<vmem>>, vector<8x32xf32>,
    return
  }
  func.func @transform_0(%arg0: i32) -> (i32, i32) {
    %c0_i32 = arith.constant 0 : i32
    %c0_i32_0 = arith.constant 0 : i32
    return %arg0, %c0_i32 : i32, i32
  }
  func.func @transform_1(%arg0: i32) -> (i32, i32) {
    %c0_i32 = arith.constant 0 : i32
    %c0_i32_0 = arith.constant 0 : i32
    return %arg0, %c0_i32 : i32, i32
  }
  func.func @transform_2(%arg0: i32) -> (i32, i32) {
    %c0_i32 = arith.constant 0 : i32
    %c0_i32_0 = arith.constant 0 : i32
    %c0_i32_1 = arith.constant 0 : i32
    return %c0_i32, %c0_i32_0 : i32, i32
  }
  func.func @transform_3(%arg0: i32) -> (i32, i32) {
    %c0_i32 = arith.constant 0 : i32
    %c0_i32_0 = arith.constant 0 : i32
    return %arg0, %c0_i32 : i32, i32
  }
}

</mosaic_0001>

<bundles_post_ra>
// kernel: actor_forward.1
= control target key start
LH: loop header
LB: loop body
LE: loop exit
PB: predicated region body
PF: predicated region fallthrough
CT: control target
= control target key end

     0   :  { %vm35_vm0 = vcmask 130048   ;;  %vm59_vm1 = vcmask 261120   ;;  %s280_s2 = inlined_call_operand.vmem [shape: f32[152,32], index: 2, kind: input, shape index: {}]   ;;  %s281_s1 = inlined_call_operand.vmem [shape: f32[8,16], index: 1, kind: input, shape index: {}]   ;;  %s282_s0 = inlined_call_operand.vmem [shape: f32[8,32], index: 0, kind: input, shape index: {}]   ;;  %s283_s3 = inlined_call_operand.vmem [shape: f32[8,32], index: 3, kind: output, shape index: {}]  }
   0x1   :  { %v19_v0 = vld [vmem:[%s280_s2 + $0x18] sm:$0xff]  ;;  %v18_v1 = vld [vmem:[%s280_s2 + $0x10] sm:$0xff]  ;;  %v21_v2 = vld [vmem:[%s280_s2 + $0x28] sm:$0xff] }
   0x2   :  { %75 = vmatpush.msra.mxu1 %v19_v0  ;;  %53 = vmatpush.msra.mxu0 %v21_v2  ;;  %v20_v3 = vld [vmem:[%s280_s2 + $0x20] sm:$0xff]  ;;  %v17_v4 = vld [vmem:[%s280_s2 + $0x8] sm:$0xff]  ;;  %v25_v8 = vld [vmem:[%s280_s2 + $0x50] sm:$0xff] }
   0x3   :  { %v15_v5 = vld [vmem:[%s281_s1] sm:$0xff]  ;;  %102 = vmatpush.msra.mxu2 %v25_v8  ;;  %v24_v9 = vld [vmem:[%s280_s2 + $0x48] sm:$0xff]  ;;  %v22_v11 = vld [vmem:[%s280_s2 + $0x38] sm:$0xff] }
   0x4   :  { %76 = vmatpush.msra.mxu1 %v18_v1  ;;  %54 = vmatpush.msra.mxu0 %v20_v3  ;;  %v16_v6 = vld [vmem:[%s280_s2] sm:$0xff]  ;;  %v29_v12 = vld [vmem:[%s280_s2 + $0x70] sm:$0xff]  ;;  %v28_v20 = vld [vmem:[%s280_s2 + $0x68] sm:$0xff] }
   0x5   :  { %178 = vmatmul.msk.f32.vlgmr.msra.gmra.mxu0 %vm35_vm0, %v15_v5  ;;  %v14_v7 = vld [vmem:[%s282_s0] sm:$0xff]  ;;  %103 = vmatpush.msra.mxu2 %v24_v9  ;;  %v34_v13 = vld [vmem:[%s280_s2 + $0x30] sm:$0xff]  ;;  %v26_v22 = vld [vmem:[%s280_s2 + $0x58] sm:$0xff] }
   0x6   :  { %77 = vmatpush.msra.mxu1 %v17_v4  ;;  %v23_v10 = vld [vmem:[%s280_s2 + $0x40] sm:$0xff]  ;;  %127 = vmatpush.msra.mxu3 %v29_v12  ;;  %v83_v15 = vperm.slane %v34_v13, 0  ;;  %v33_v23 = vld [vmem:[%s280_s2 + $0x90] sm:$0xff]  ;;  %v32_v24 = vld [vmem:[%s280_s2 + $0x88] sm:$0xff]  ;;  %v86_v25 = vperm.slane %v34_v13, 1  ;;  %v111_v31 = vperm.slane %v34_v13, 2 }
   0x7   :  { %104 = vmatpush.msra.mxu2 %v23_v10  ;;  %v27_v21 = vld [vmem:[%s280_s2 + $0x60] sm:$0xff]  ;;  %152 = vmatpush.msrb.mxu0 %v33_v23  ;;  %v30_v30 = vld [vmem:[%s280_s2 + $0x78] sm:$0xff]  ;;  %v136_v35 = vperm.slane %v34_v13, 3 }
   0x8   :  { %78 = vmatpush.msra.mxu1 %v16_v6  ;;  %128 = vmatpush.msra.mxu3 %v28_v20  ;;  %v31_v29 = vld [vmem:[%s280_s2 + $0x80] sm:$0xff] }
   0x9   :  { %179 = vmatmul.msk.f32.vlgmr.msra.gmra.mxu1 %vm59_vm1, %v14_v7  ;;  %105 = vmatpush.msra.mxu2 %v22_v11 }
   0xa   :  { %129 = vmatpush.msra.mxu3 %v27_v21  ;;  %153 = vmatpush.msrb.mxu0 %v32_v24 }
   0xc   :  { %130 = vmatpush.msra.mxu3 %v26_v22  ;;  %154 = vmatpush.msrb.mxu0 %v31_v29 }
   0xe   :  { %155 = vmatpush.msrb.mxu0 %v30_v30 }
  0x82   :  { %v56_v14 = vpop.f32.mrf.mxu0 }
  0x86   :  { %v80_v16 = vpop.f32.mrf.mxu1 }
  0x87   :  { %v81_v17 = vadd.f32 %v80_v16, %v56_v14 }
  0x89   :  { %v84_v18 = vadd.f32 %v83_v15, %v81_v17 }
  0x8b   :  { %v85_v19 = vmax.f32 %v84_v18, 0.0 }
  0x8d   :  { %180 = vmatmul.msk.f32.vlgmr.msra.gmra.mxu2 %vm59_vm1, %v85_v19 }
 0x110   :  { %v107_v26 = vpop.f32.mrf.mxu2 }
 0x111   :  { %v108_v27 = vadd.f32 %v107_v26, %v86_v25 }
 0x113   :  { %v110_v28 = vmax.f32 %v108_v27, 0.0 }
 0x115   :  { %181 = vmatmul.msk.f32.vlgmr.msra.gmra.mxu3 %vm59_vm1, %v110_v28 }
 0x198   :  { %v132_v32 = vpop.f32.mrf.mxu3 }
 0x199   :  { %v133_v33 = vadd.f32 %v132_v32, %v111_v31 }
 0x19b   :  { %v135_v34 = vmax.f32 %v133_v33, 0.0 }
 0x19d   :  { %182 = vmatmul.msk.f32.vlgmr.msrb.gmra.mxu0 %vm59_vm1, %v135_v34 }
 0x21a   :  { %v157_v36 = vpop.f32.mrf.mxu0 }
 0x21b   :  { %v158_v37 = vadd.f32 %v157_v36, %v136_v35 }
 0x21d   :  { %v160_v38 = vsel %vm59_vm1, %v158_v37, -inf }
 0x21e   :  { %161 = vmax.xlane.f32.xlu0 %v160_v38 }
 0x291   :  { %v162_v39 = vpop.xlane.xlu0 %161 }
 0x292   :  { %v163_v40 = vsub.f32 %v158_v37, %v162_v39 }
 0x294   :  { %v164_v41 = vmul.f32 1.442695, %v163_v40 }
 0x296   :  { %183 = vpow2.f32 %v164_v41 }
 0x29c   :  { %v184_v42 = vpop.eup %183 }
 0x29d   :  { %v166_v43 = vsel %vm59_vm1, %v184_v42, 0.0 }
 0x29e   :  { %167 = vadd.xlane.f32.xlu0 %v166_v43 }
 0x311   :  { %v168_v44 = vpop.xlane.xlu0 %167 }
 0x312   :  { %185 = vrcp.f32 %v168_v44 }
 0x318   :  { %v186_v45 = vpop.eup %185 }
 0x319   :  { %v170_v46 = vmul.f32 %v186_v45, %v184_v42 }
 0x31b   :  { %v171_v47 = vmul.f32 0.99, %v170_v46 }
 0x31d   :  { %v172_v48 = vadd.f32 0.00125, %v171_v47 }
 0x31f   :  { %173 = vst.msk [vmem:[%s283_s3] sm:$0xff] %vm59_vm1, %v172_v48 }

</bundles_post_ra>
